<compile_context>
chip_gen: v7x
topology: tpu7x:2x2x1
jax: 0.10.0
libtpu: 0.0.40
codegen_flags: <defaults>
</compile_context>

<pallas_src>
import functools

import jax
import jax.numpy as jnp
from jax import lax
from jax.experimental import pallas as pl
from jax.experimental.pallas import tpu as pltpu


def _causal_attn_kernel(x_ref, wq_ref, wk_ref, wv_ref, wproj_ref, bproj_ref,
                        mask_ref, o_ref, q_s, k_s, v_s, ctx_s,
                        *, num_heads, head_dim):
    # x_ref:     (N, C)      current batch element
    # wq/wk/wv:  (C, C)      bf16, full-width projections (scale folded into wq)
    # wproj_ref: (C, C)      bf16 output projection
    # bproj_ref: (1, C)      f32 bias
    # mask_ref:  (N, N)      f32 additive causal mask (0 / -inf), resident
    # o_ref:     (N, C)      output (block index constant over the head axis)
    # q_s/k_s/v_s/ctx_s: (H, N, D) bf16 VMEM scratches (head-major, lane-dense)
    h = pl.program_id(1)
    D = head_dim

    @pl.when(h == 0)
    def _():
        # Hoisted full-width QKV projection: bf16 MXU operands, f32 accumulate.
        x_bf = x_ref[...].astype(jnp.bfloat16)
        qf = jnp.dot(x_bf, wq_ref[...], preferred_element_type=jnp.float32)
        kf = jnp.dot(x_bf, wk_ref[...], preferred_element_type=jnp.float32)
        vf = jnp.dot(x_bf, wv_ref[...], preferred_element_type=jnp.float32)
        # Re-stage (N, C) -> head-major (H, N, D) so per-head tiles are
        # lane-dense reads (static unroll, runs only at h == 0).
        for i in range(num_heads):
            sl = slice(i * D, (i + 1) * D)
            q_s[i] = qf[:, sl].astype(jnp.bfloat16)
            k_s[i] = kf[:, sl].astype(jnp.bfloat16)
            v_s[i] = vf[:, sl].astype(jnp.bfloat16)

    q = q_s[h]                       # (N, D) bf16, softmax scale pre-folded
    k = k_s[h]
    v = v_s[h]

    # Scores: contract the last axes directly (no explicit k.T materialization).
    s = lax.dot_general(q, k, (((1,), (1,)), ((), ())),
                        preferred_element_type=jnp.float32)        # (N, N) f32
    s = s + mask_ref[...]            # additive causal mask (0 on/below diag)

    # Softmax with deferred normalization (normalize after the PV matmul).
    m = jnp.max(s, axis=-1, keepdims=True)
    e = jnp.exp(s - m)                                             # (N, N) f32
    denom = jnp.sum(e, axis=-1, keepdims=True)                     # (N, 1) f32

    ctx = jnp.dot(e.astype(jnp.bfloat16), v,
                  preferred_element_type=jnp.float32)              # (N, D) f32
    ctx = ctx * pl.reciprocal(denom, approx=False)   # attn_drop(0.0) == id
    ctx_s[h] = ctx.astype(jnp.bfloat16)

    @pl.when(h == num_heads - 1)
    def _():
        # One fused output projection with full contraction depth K = C.
        ctx_full = jnp.concatenate(
            [ctx_s[i] for i in range(num_heads)], axis=-1)         # (N, C) bf16
        out = jnp.dot(ctx_full, wproj_ref[...],
                      preferred_element_type=jnp.float32)          # (N, C) f32
        # proj bias; proj_drop(0.0) == identity
        o_ref[...] = (out + bproj_ref[...]).astype(o_ref.dtype)


def prepare_causal_attention_params(w_qkv, w_proj, b_proj, *, num_heads):
    """One-time (parameter-load-time) re-layout: split fused QKV weight into
    Q/K/V slabs, fold the softmax scale into Wq, cast MXU operands to bf16."""
    C = w_qkv.shape[0]
    assert w_qkv.shape == (C, 3 * C) and C % num_heads == 0
    D = C // num_heads
    scale = float(D) ** -0.5
    # Output columns of w_qkv are ordered (3, H, D): [:, :C]=Q, [C:2C]=K, [2C:]=V.
    wq = (w_qkv[:, :C] * scale).astype(jnp.bfloat16)   # fold scale into Wq
    wk = w_qkv[:, C:2 * C].astype(jnp.bfloat16)
    wv = w_qkv[:, 2 * C:].astype(jnp.bfloat16)
    wp = w_proj.astype(jnp.bfloat16)
    bp = b_proj.reshape(1, C).astype(jnp.float32)
    return wq, wk, wv, wp, bp


def causal_attention(x, params, *, num_heads):
    wq, wk, wv, wp, bp = params
    B, N, C = x.shape
    D = C // num_heads

    # Additive causal mask: 0 on/below the diagonal, -inf above (col > row).
    idx = jnp.arange(N, dtype=jnp.int32)
    causal_mask = jnp.where(idx[None, :] > idx[:, None],
                            jnp.float32(-jnp.inf), jnp.float32(0.0))

    kernel = functools.partial(_causal_attn_kernel,
                               num_heads=num_heads, head_dim=D)

    # TODO(synk): for large N, add a q-block grid axis ("parallel", helps v7x's
    # 2 TCs) with flash-style online softmax over kv blocks + causal block
    # skipping, and size tiles from pltpu.get_tpu_info().vmem_capacity_bytes
    # (64 MiB v7x vs 128 MiB v5e/v6e). At these sizes the (N, N) tile fits.
    return pl.pallas_call(
        kernel,
        out_shape=jax.ShapeDtypeStruct((B, N, C), x.dtype),
        grid_spec=pltpu.PrefetchScalarGridSpec(
            num_scalar_prefetch=0,
            grid=(B, num_heads),          # reduction (head) axis last
            in_specs=[
                pl.BlockSpec((pl.Squeezed(), N, C), lambda b, h: (b, 0, 0)),  # x
                pl.BlockSpec((C, C), lambda b, h: (0, 0)),                    # wq
                pl.BlockSpec((C, C), lambda b, h: (0, 0)),                    # wk
                pl.BlockSpec((C, C), lambda b, h: (0, 0)),                    # wv
                pl.BlockSpec((C, C), lambda b, h: (0, 0)),                    # w_proj
                pl.BlockSpec((1, C), lambda b, h: (0, 0)),                    # b_proj
                pl.BlockSpec((N, N), lambda b, h: (0, 0)),                    # mask
            ],
            out_specs=pl.BlockSpec((pl.Squeezed(), N, C), lambda b, h: (b, 0, 0)),
            scratch_shapes=[
                pltpu.VMEM((num_heads, N, D), jnp.bfloat16),   # q (pre-scaled)
                pltpu.VMEM((num_heads, N, D), jnp.bfloat16),   # k
                pltpu.VMEM((num_heads, N, D), jnp.bfloat16),   # v
                pltpu.VMEM((num_heads, N, D), jnp.bfloat16),   # per-head context
            ],
        ),
        compiler_params=pltpu.CompilerParams(
            dimension_semantics=("parallel", "arbitrary"),
            vmem_limit_bytes=32 * 1024 * 1024,   # within budget on v5e/v6e/v7x
        ),
    )(x, wq, wk, wv, wp, bp, causal_mask)


def causal_attention_ref(x, w_qkv, w_proj, b_proj, *, num_heads):
    """Pure-JAX f32 reference mirroring the PyTorch forward."""
    B, N, C = x.shape
    D = C // num_heads
    scale = D ** (-0.5)
    qkv = jnp.einsum("bnc,cd->bnd", x, w_qkv)                 # (B, N, 3C)
    qkv = qkv.reshape(B, N, 3, num_heads, D).transpose(2, 0, 3, 1, 4)
    q, k, v = qkv[0], qkv[1], qkv[2]                          # (B, H, N, D)
    attn = jnp.einsum("bhnd,bhmd->bhnm", q, k) * scale
    mask = jnp.triu(jnp.ones((N, N)), k=1)[None, None]
    attn = jnp.where(mask == 1, -jnp.inf, attn)
    attn = jax.nn.softmax(attn, axis=-1)
    out = jnp.einsum("bhnm,bhmd->bhnd", attn, v)
    out = out.transpose(0, 2, 1, 3).reshape(B, N, C)
    return jnp.einsum("bnc,cd->bnd", out, w_proj) + b_proj[None]


if __name__ == "__main__":
    B, N, C = 2, 8, 32
    num_heads = 8

    key = jax.random.PRNGKey(0)
    kx, kq, kp, kb = jax.random.split(key, 4)

    x = jax.random.normal(kx, (B, N, C), dtype=jnp.float32)
    # Deterministic synthetic parameters (nn.Linear(dim, 3*dim, bias=False),
    # nn.Linear(dim, dim) -> weight + bias). Stored pre-transposed: y = x @ W.
    w_qkv = jax.random.normal(kq, (C, 3 * C), dtype=jnp.float32) * 0.1
    w_proj = jax.random.normal(kp, (C, C), dtype=jnp.float32) * 0.1
    b_proj = jax.random.normal(kb, (1, C), dtype=jnp.float32) * 0.1

    params = prepare_causal_attention_params(w_qkv, w_proj, b_proj,
                                             num_heads=num_heads)
    out = causal_attention(x, params, num_heads=num_heads)
    out = jax.block_until_ready(out)

    ref = causal_attention_ref(x, w_qkv, w_proj, b_proj, num_heads=num_heads)
    # Tolerance reflects bf16 MXU operands (with f32 accumulation) vs the pure
    # f32 reference.
    assert jnp.allclose(out, ref, atol=2e-2, rtol=2e-2), "mismatch vs reference"

    print("KERNEL_OK")
</pallas_src>

<mosaic_0001>
module attributes {stable_mosaic.version = 11 : i64} {
  func.func @_causal_attn_kernel(%arg0: i32, %arg1: i32, %arg2: memref<1x8x32xf32, #tpu.memory_space<vmem>>, %arg3: memref<32x32xbf16, #tpu.memory_space<vmem>>, %arg4: memref<32x32xbf16, #tpu.memory_space<vmem>>, %arg5: memref<32x32xbf16, #tpu.memory_space<vmem>>, %arg6: memref<32x32xbf16, #tpu.memory_space<vmem>>, %arg7: memref<1x32xf32, #tpu.memory_space<vmem>>, %arg8: memref<8x8xf32, #tpu.memory_space<vmem>>, %arg9: memref<1x8x32xf32, #tpu.memory_space<vmem>>, %arg10: memref<8x8x4xbf16, #tpu.memory_space<vmem>>, %arg11: memref<8x8x4xbf16, #tpu.memory_space<vmem>>, %arg12: memref<8x8x4xbf16, #tpu.memory_space<vmem>>, %arg13: memref<8x8x4xbf16, #tpu.memory_space<vmem>>) attributes {dimension_semantics = [#tpu.dimension_semantics<parallel>, #tpu.dimension_semantics<arbitrary>], iteration_bounds = array<i64: 2, 8>, scalar_prefetch = 0 : i64, scratch_operands = 4 : i64, tpu.core_type = #tpu.core_type<tc>, window_params = [{transform_indices = @transform_0, window_bounds = array<i64: 1, 8, 32>}, {pipeline_mode = #tpu.pipeline_mode<synchronous>, transform_indices = @transform_1, window_bounds = array<i64: 32, 32>}, {pipeline_mode = #tpu.pipeline_mode<synchronous>, transform_indices = @transform_2, window_bounds = array<i64: 32, 32>}, {pipeline_mode = #tpu.pipeline_mode<synchronous>, transform_indices = @transform_3, window_bounds = array<i64: 32, 32>}, {pipeline_mode = #tpu.pipeline_mode<synchronous>, transform_indices = @transform_4, window_bounds = array<i64: 32, 32>}, {pipeline_mode = #tpu.pipeline_mode<synchronous>, transform_indices = @transform_5, window_bounds = array<i64: 1, 32>}, {pipeline_mode = #tpu.pipeline_mode<synchronous>, transform_indices = @transform_6, window_bounds = array<i64: 8, 8>}, {transform_indices = @transform_7, window_bounds = array<i64: 1, 8, 32>}]} {
    %c0_i32 = arith.constant 0 : i32
    %0 = arith.cmpi eq, %arg1, %c0_i32 : i32
    %1 = arith.extui %0 : i1 to i32
    %c0_i32_0 = arith.constant 0 : i32
    %2 = arith.cmpi ne, %1, %c0_i32_0 : i32
    scf.if %2 {
      %c0_14 = arith.constant 0 : index
      %c0_15 = arith.constant 0 : index
      %c0_16 = arith.constant 0 : index
      %35 = vector.load %arg2[%c0_14, %c0_15, %c0_16] : memref<1x8x32xf32, #tpu.memory_space<vmem>>, vector<1x8x32xf32>
      %36 = vector.shape_cast %35 : vector<1x8x32xf32> to vector<8x32xf32>
      %37 = arith.truncf %36 : vector<8x32xf32> to vector<8x32xbf16>
      %c0_17 = arith.constant 0 : index
      %c0_18 = arith.constant 0 : index
      %38 = vector.load %arg3[%c0_17, %c0_18] : memref<32x32xbf16, #tpu.memory_space<vmem>>, vector<32x32xbf16>
      %cst_19 = arith.constant dense<0.000000e+00> : vector<8x32xf32>
      %39 = tpu.matmul %37, %38, %cst_19 {dimension_numbers = #tpu.dot_dimension_numbers<[1], [0], [0], [1], [0, 0, 1, 1], [], []>} : vector<8x32xbf16>, vector<32x32xbf16>, vector<8x32xf32> -> vector<8x32xf32>
      %c0_20 = arith.constant 0 : index
      %c0_21 = arith.constant 0 : index
      %40 = vector.load %arg4[%c0_20, %c0_21] : memref<32x32xbf16, #tpu.memory_space<vmem>>, vector<32x32xbf16>
      %cst_22 = arith.constant dense<0.000000e+00> : vector<8x32xf32>
      %41 = tpu.matmul %37, %40, %cst_22 {dimension_numbers = #tpu.dot_dimension_numbers<[1], [0], [0], [1], [0, 0, 1, 1], [], []>} : vector<8x32xbf16>, vector<32x32xbf16>, vector<8x32xf32> -> vector<8x32xf32>
      %c0_23 = arith.constant 0 : index
      %c0_24 = arith.constant 0 : index
      %42 = vector.load %arg5[%c0_23, %c0_24] : memref<32x32xbf16, #tpu.memory_space<vmem>>, vector<32x32xbf16>
      %cst_25 = arith.constant dense<0.000000e+00> : vector<8x32xf32>
      %43 = tpu.matmul %37, %42, %cst_25 {dimension_numbers = #tpu.dot_dimension_numbers<[1], [0], [0], [1], [0, 0, 1, 1], [], []>} : vector<8x32xbf16>, vector<32x32xbf16>, vector<8x32xf32> -> vector<8x32xf32>
      %44 = vector.extract_strided_slice %39 {offsets = [0, 0], sizes = [8, 4], strides = [1, 1]} : vector<8x32xf32> to vector<8x4xf32>
      %45 = arith.truncf %44 : vector<8x4xf32> to vector<8x4xbf16>
      %c0_26 = arith.constant 0 : index
      %c0_27 = arith.constant 0 : index
      %c0_28 = arith.constant 0 : index
      %46 = vector.load %arg10[%c0_26, %c0_27, %c0_28] : memref<8x8x4xbf16, #tpu.memory_space<vmem>>, vector<1x8x4xbf16>
      %47 = vector.shape_cast %46 : vector<1x8x4xbf16> to vector<8x4xbf16>
      %48 = vector.shape_cast %45 : vector<8x4xbf16> to vector<1x8x4xbf16>
      tpu.vector_store %arg10[%c0_26, %c0_27, %c0_28], %48 {strides = array<i32>} : memref<8x8x4xbf16, #tpu.memory_space<vmem>>, vector<1x8x4xbf16>,
      %49 = vector.extract_strided_slice %41 {offsets = [0, 0], sizes = [8, 4], strides = [1, 1]} : vector<8x32xf32> to vector<8x4xf32>
      %50 = arith.truncf %49 : vector<8x4xf32> to vector<8x4xbf16>
      %c0_29 = arith.constant 0 : index
      %c0_30 = arith.constant 0 : index
      %c0_31 = arith.constant 0 : index
      %51 = vector.load %arg11[%c0_29, %c0_30, %c0_31] : memref<8x8x4xbf16, #tpu.memory_space<vmem>>, vector<1x8x4xbf16>
      %52 = vector.shape_cast %51 : vector<1x8x4xbf16> to vector<8x4xbf16>
      %53 = vector.shape_cast %50 : vector<8x4xbf16> to vector<1x8x4xbf16>
      tpu.vector_store %arg11[%c0_29, %c0_30, %c0_31], %53 {strides = array<i32>} : memref<8x8x4xbf16, #tpu.memory_space<vmem>>, vector<1x8x4xbf16>,
      %54 = vector.extract_strided_slice %43 {offsets = [0, 0], sizes = [8, 4], strides = [1, 1]} : vector<8x32xf32> to vector<8x4xf32>
      %55 = arith.truncf %54 : vector<8x4xf32> to vector<8x4xbf16>
      %c0_32 = arith.constant 0 : index
      %c0_33 = arith.constant 0 : index
      %c0_34 = arith.constant 0 : index
      %56 = vector.load %arg12[%c0_32, %c0_33, %c0_34] : memref<8x8x4xbf16, #tpu.memory_space<vmem>>, vector<1x8x4xbf16>
      %57 = vector.shape_cast %56 : vector<1x8x4xbf16> to vector<8x4xbf16>
      %58 = vector.shape_cast %55 : vector<8x4xbf16> to vector<1x8x4xbf16>
      tpu.vector_store %arg12[%c0_32, %c0_33, %c0_34], %58 {strides = array<i32>} : memref<8x8x4xbf16, #tpu.memory_space<vmem>>, vector<1x8x4xbf16>,
      %59 = vector.extract_strided_slice %39 {offsets = [0, 4], sizes = [8, 4], strides = [1, 1]} : vector<8x32xf32> to vector<8x4xf32>
      %60 = arith.truncf %59 : vector<8x4xf32> to vector<8x4xbf16>
      %c1 = arith.constant 1 : index
      %c0_35 = arith.constant 0 : index
      %c0_36 = arith.constant 0 : index
      %61 = vector.load %arg10[%c1, %c0_35, %c0_36] : memref<8x8x4xbf16, #tpu.memory_space<vmem>>, vector<1x8x4xbf16>
      %62 = vector.shape_cast %61 : vector<1x8x4xbf16> to vector<8x4xbf16>
      %63 = vector.shape_cast %60 : vector<8x4xbf16> to vector<1x8x4xbf16>
      tpu.vector_store %arg10[%c1, %c0_35, %c0_36], %63 {strides = array<i32>} : memref<8x8x4xbf16, #tpu.memory_space<vmem>>, vector<1x8x4xbf16>,
      %64 = vector.extract_strided_slice %41 {offsets = [0, 4], sizes = [8, 4], strides = [1, 1]} : vector<8x32xf32> to vector<8x4xf32>
      %65 = arith.truncf %64 : vector<8x4xf32> to vector<8x4xbf16>
      %c1_37 = arith.constant 1 : index
      %c0_38 = arith.constant 0 : index
      %c0_39 = arith.constant 0 : index
      %66 = vector.load %arg11[%c1_37, %c0_38, %c0_39] : memref<8x8x4xbf16, #tpu.memory_space<vmem>>, vector<1x8x4xbf16>
      %67 = vector.shape_cast %66 : vector<1x8x4xbf16> to vector<8x4xbf16>
      %68 = vector.shape_cast %65 : vector<8x4xbf16> to vector<1x8x4xbf16>
      tpu.vector_store %arg11[%c1_37, %c0_38, %c0_39], %68 {strides = array<i32>} : memref<8x8x4xbf16, #tpu.memory_space<vmem>>, vector<1x8x4xbf16>,
      %69 = vector.extract_strided_slice %43 {offsets = [0, 4], sizes = [8, 4], strides = [1, 1]} : vector<8x32xf32> to vector<8x4xf32>
      %70 = arith.truncf %69 : vector<8x4xf32> to vector<8x4xbf16>
      %c1_40 = arith.constant 1 : index
      %c0_41 = arith.constant 0 : index
      %c0_42 = arith.constant 0 : index
      %71 = vector.load %arg12[%c1_40, %c0_41, %c0_42] : memref<8x8x4xbf16, #tpu.memory_space<vmem>>, vector<1x8x4xbf16>
      %72 = vector.shape_cast %71 : vector<1x8x4xbf16> to vector<8x4xbf16>
      %73 = vector.shape_cast %70 : vector<8x4xbf16> to vector<1x8x4xbf16>
      tpu.vector_store %arg12[%c1_40, %c0_41, %c0_42], %73 {strides = array<i32>} : memref<8x8x4xbf16, #tpu.memory_space<vmem>>, vector<1x8x4xbf16>,
      %74 = vector.extract_strided_slice %39 {offsets = [0, 8], sizes = [8, 4], strides = [1, 1]} : vector<8x32xf32> to vector<8x4xf32>
      %75 = arith.truncf %74 : vector<8x4xf32> to vector<8x4xbf16>
      %c2 = arith.constant 2 : index
      %c0_43 = arith.constant 0 : index
      %c0_44 = arith.constant 0 : index
      %76 = vector.load %arg10[%c2, %c0_43, %c0_44] : memref<8x8x4xbf16, #tpu.memory_space<vmem>>, vector<1x8x4xbf16>
      %77 = vector.shape_cast %76 : vector<1x8x4xbf16> to vector<8x4xbf16>
      %78 = vector.shape_cast %75 : vector<8x4xbf16> to vector<1x8x4xbf16>
      tpu.vector_store %arg10[%c2, %c0_43, %c0_44], %78 {strides = array<i32>} : memref<8x8x4xbf16, #tpu.memory_space<vmem>>, vector<1x8x4xbf16>,
      %79 = vector.extract_strided_slice %41 {offsets = [0, 8], sizes = [8, 4], strides = [1, 1]} : vector<8x32xf32> to vector<8x4xf32>
      %80 = arith.truncf %79 : vector<8x4xf32> to vector<8x4xbf16>
      %c2_45 = arith.constant 2 : index
      %c0_46 = arith.constant 0 : index
      %c0_47 = arith.constant 0 : index
      %81 = vector.load %arg11[%c2_45, %c0_46, %c0_47] : memref<8x8x4xbf16, #tpu.memory_space<vmem>>, vector<1x8x4xbf16>
      %82 = vector.shape_cast %81 : vector<1x8x4xbf16> to vector<8x4xbf16>
      %83 = vector.shape_cast %80 : vector<8x4xbf16> to vector<1x8x4xbf16>
      tpu.vector_store %arg11[%c2_45, %c0_46, %c0_47], %83 {strides = array<i32>} : memref<8x8x4xbf16, #tpu.memory_space<vmem>>, vector<1x8x4xbf16>,
      %84 = vector.extract_strided_slice %43 {offsets = [0, 8], sizes = [8, 4], strides = [1, 1]} : vector<8x32xf32> to vector<8x4xf32>
      %85 = arith.truncf %84 : vector<8x4xf32> to vector<8x4xbf16>
      %c2_48 = arith.constant 2 : index
      %c0_49 = arith.constant 0 : index
      %c0_50 = arith.constant 0 : index
      %86 = vector.load %arg12[%c2_48, %c0_49, %c0_50] : memref<8x8x4xbf16, #tpu.memory_space<vmem>>, vector<1x8x4xbf16>
      %87 = vector.shape_cast %86 : vector<1x8x4xbf16> to vector<8x4xbf16>
      %88 = vector.shape_cast %85 : vector<8x4xbf16> to vector<1x8x4xbf16>
      tpu.vector_store %arg12[%c2_48, %c0_49, %c0_50], %88 {strides = array<i32>} : memref<8x8x4xbf16, #tpu.memory_space<vmem>>, vector<1x8x4xbf16>,
      %89 = vector.extract_strided_slice %39 {offsets = [0, 12], sizes = [8, 4], strides = [1, 1]} : vector<8x32xf32> to vector<8x4xf32>
      %90 = arith.truncf %89 : vector<8x4xf32> to vector<8x4xbf16>
      %c3 = arith.constant 3 : index
      %c0_51 = arith.constant 0 : index
      %c0_52 = arith.constant 0 : index
      %91 = vector.load %arg10[%c3, %c0_51, %c0_52] : memref<8x8x4xbf16, #tpu.memory_space<vmem>>, vector<1x8x4xbf16>
      %92 = vector.shape_cast %91 : vector<1x8x4xbf16> to vector<8x4xbf16>
      %93 = vector.shape_cast %90 : vector<8x4xbf16> to vector<1x8x4xbf16>
      tpu.vector_store %arg10[%c3, %c0_51, %c0_52], %93 {strides = array<i32>} : memref<8x8x4xbf16, #tpu.memory_space<vmem>>, vector<1x8x4xbf16>,
      %94 = vector.extract_strided_slice %41 {offsets = [0, 12], sizes = [8, 4], strides = [1, 1]} : vector<8x32xf32> to vector<8x4xf32>
      %95 = arith.truncf %94 : vector<8x4xf32> to vector<8x4xbf16>
      %c3_53 = arith.constant 3 : index
      %c0_54 = arith.constant 0 : index
      %c0_55 = arith.constant 0 : index
      %96 = vector.load %arg11[%c3_53, %c0_54, %c0_55] : memref<8x8x4xbf16, #tpu.memory_space<vmem>>, vector<1x8x4xbf16>
      %97 = vector.shape_cast %96 : vector<1x8x4xbf16> to vector<8x4xbf16>
      %98 = vector.shape_cast %95 : vector<8x4xbf16> to vector<1x8x4xbf16>
      tpu.vector_store %arg11[%c3_53, %c0_54, %c0_55], %98 {strides = array<i32>} : memref<8x8x4xbf16, #tpu.memory_space<vmem>>, vector<1x8x4xbf16>,
      %99 = vector.extract_strided_slice %43 {offsets = [0, 12], sizes = [8, 4], strides = [1, 1]} : vector<8x32xf32> to vector<8x4xf32>
      %100 = arith.truncf %99 : vector<8x4xf32> to vector<8x4xbf16>
      %c3_56 = arith.constant 3 : index
      %c0_57 = arith.constant 0 : index
      %c0_58 = arith.constant 0 : index
      %101 = vector.load %arg12[%c3_56, %c0_57, %c0_58] : memref<8x8x4xbf16, #tpu.memory_space<vmem>>, vector<1x8x4xbf16>
      %102 = vector.shape_cast %101 : vector<1x8x4xbf16> to vector<8x4xbf16>
      %103 = vector.shape_cast %100 : vector<8x4xbf16> to vector<1x8x4xbf16>
      tpu.vector_store %arg12[%c3_56, %c0_57, %c0_58], %103 {strides = array<i32>} : memref<8x8x4xbf16, #tpu.memory_space<vmem>>, vector<1x8x4xbf16>,
      %104 = vector.extract_strided_slice %39 {offsets = [0, 16], sizes = [8, 4], strides = [1, 1]} : vector<8x32xf32> to vector<8x4xf32>
      %105 = arith.truncf %104 : vector<8x4xf32> to vector<8x4xbf16>
      %c4 = arith.constant 4 : index
      %c0_59 = arith.constant 0 : index
      %c0_60 = arith.constant 0 : index
      %106 = vector.load %arg10[%c4, %c0_59, %c0_60] : memref<8x8x4xbf16, #tpu.memory_space<vmem>>, vector<1x8x4xbf16>
      %107 = vector.shape_cast %106 : vector<1x8x4xbf16> to vector<8x4xbf16>
      %108 = vector.shape_cast %105 : vector<8x4xbf16> to vector<1x8x4xbf16>
      tpu.vector_store %arg10[%c4, %c0_59, %c0_60], %108 {strides = array<i32>} : memref<8x8x4xbf16, #tpu.memory_space<vmem>>, vector<1x8x4xbf16>,
      %109 = vector.extract_strided_slice %41 {offsets = [0, 16], sizes = [8, 4], strides = [1, 1]} : vector<8x32xf32> to vector<8x4xf32>
      %110 = arith.truncf %109 : vector<8x4xf32> to vector<8x4xbf16>
      %c4_61 = arith.constant 4 : index
      %c0_62 = arith.constant 0 : index
      %c0_63 = arith.constant 0 : index
      %111 = vector.load %arg11[%c4_61, %c0_62, %c0_63] : memref<8x8x4xbf16, #tpu.memory_space<vmem>>, vector<1x8x4xbf16>
      %112 = vector.shape_cast %111 : vector<1x8x4xbf16> to vector<8x4xbf16>
      %113 = vector.shape_cast %110 : vector<8x4xbf16> to vector<1x8x4xbf16>
      tpu.vector_store %arg11[%c4_61, %c0_62, %c0_63], %113 {strides = array<i32>} : memref<8x8x4xbf16, #tpu.memory_space<vmem>>, vector<1x8x4xbf16>,
      %114 = vector.extract_strided_slice %43 {offsets = [0, 16], sizes = [8, 4], strides = [1, 1]} : vector<8x32xf32> to vector<8x4xf32>
      %115 = arith.truncf %114 : vector<8x4xf32> to vector<8x4xbf16>
      %c4_64 = arith.constant 4 : index
      %c0_65 = arith.constant 0 : index
      %c0_66 = arith.constant 0 : index
      %116 = vector.load %arg12[%c4_64, %c0_65, %c0_66] : memref<8x8x4xbf16, #tpu.memory_space<vmem>>, vector<1x8x4xbf16>
      %117 = vector.shape_cast %116 : vector<1x8x4xbf16> to vector<8x4xbf16>
      %118 = vector.shape_cast %115 : vector<8x4xbf16> to vector<1x8x4xbf16>
      tpu.vector_store %arg12[%c4_64, %c0_65, %c0_66], %118 {strides = array<i32>} : memref<8x8x4xbf16, #tpu.memory_space<vmem>>, vector<1x8x4xbf16>,
      %119 = vector.extract_strided_slice %39 {offsets = [0, 20], sizes = [8, 4], strides = [1, 1]} : vector<8x32xf32> to vector<8x4xf32>
      %120 = arith.truncf %119 : vector<8x4xf32> to vector<8x4xbf16>
      %c5 = arith.constant 5 : index
      %c0_67 = arith.constant 0 : index
      %c0_68 = arith.constant 0 : index
      %121 = vector.load %arg10[%c5, %c0_67, %c0_68] : memref<8x8x4xbf16, #tpu.memory_space<vmem>>, vector<1x8x4xbf16>
      %122 = vector.shape_cast %121 : vector<1x8x4xbf16> to vector<8x4xbf16>
      %123 = vector.shape_cast %120 : vector<8x4xbf16> to vector<1x8x4xbf16>
      tpu.vector_store %arg10[%c5, %c0_67, %c0_68], %123 {strides = array<i32>} : memref<8x8x4xbf16, #tpu.memory_space<vmem>>, vector<1x8x4xbf16>,
      %124 = vector.extract_strided_slice %41 {offsets = [0, 20], sizes = [8, 4], strides = [1, 1]} : vector<8x32xf32> to vector<8x4xf32>
      %125 = arith.truncf %124 : vector<8x4xf32> to vector<8x4xbf16>
      %c5_69 = arith.constant 5 : index
      %c0_70 = arith.constant 0 : index
      %c0_71 = arith.constant 0 : index
      %126 = vector.load %arg11[%c5_69, %c0_70, %c0_71] : memref<8x8x4xbf16, #tpu.memory_space<vmem>>, vector<1x8x4xbf16>
      %127 = vector.shape_cast %126 : vector<1x8x4xbf16> to vector<8x4xbf16>
      %128 = vector.shape_cast %125 : vector<8x4xbf16> to vector<1x8x4xbf16>
      tpu.vector_store %arg11[%c5_69, %c0_70, %c0_71], %128 {strides = array<i32>} : memref<8x8x4xbf16, #tpu.memory_space<vmem>>, vector<1x8x4xbf16>,
      %129 = vector.extract_strided_slice %43 {offsets = [0, 20], sizes = [8, 4], strides = [1, 1]} : vector<8x32xf32> to vector<8x4xf32>
      %130 = arith.truncf %129 : vector<8x4xf32> to vector<8x4xbf16>
      %c5_72 = arith.constant 5 : index
      %c0_73 = arith.constant 0 : index
      %c0_74 = arith.constant 0 : index
      %131 = vector.load %arg12[%c5_72, %c0_73, %c0_74] : memref<8x8x4xbf16, #tpu.memory_space<vmem>>, vector<1x8x4xbf16>
      %132 = vector.shape_cast %131 : vector<1x8x4xbf16> to vector<8x4xbf16>
      %133 = vector.shape_cast %130 : vector<8x4xbf16> to vector<1x8x4xbf16>
      tpu.vector_store %arg12[%c5_72, %c0_73, %c0_74], %133 {strides = array<i32>} : memref<8x8x4xbf16, #tpu.memory_space<vmem>>, vector<1x8x4xbf16>,
      %134 = vector.extract_strided_slice %39 {offsets = [0, 24], sizes = [8, 4], strides = [1, 1]} : vector<8x32xf32> to vector<8x4xf32>
      %135 = arith.truncf %134 : vector<8x4xf32> to vector<8x4xbf16>
      %c6 = arith.constant 6 : index
      %c0_75 = arith.constant 0 : index
      %c0_76 = arith.constant 0 : index
      %136 = vector.load %arg10[%c6, %c0_75, %c0_76] : memref<8x8x4xbf16, #tpu.memory_space<vmem>>, vector<1x8x4xbf16>
      %137 = vector.shape_cast %136 : vector<1x8x4xbf16> to vector<8x4xbf16>
      %138 = vector.shape_cast %135 : vector<8x4xbf16> to vector<1x8x4xbf16>
      tpu.vector_store %arg10[%c6, %c0_75, %c0_76], %138 {strides = array<i32>} : memref<8x8x4xbf16, #tpu.memory_space<vmem>>, vector<1x8x4xbf16>,
      %139 = vector.extract_strided_slice %41 {offsets = [0, 24], sizes = [8, 4], strides = [1, 1]} : vector<8x32xf32> to vector<8x4xf32>
      %140 = arith.truncf %139 : vector<8x4xf32> to vector<8x4xbf16>
      %c6_77 = arith.constant 6 : index
      %c0_78 = arith.constant 0 : index
      %c0_79 = arith.constant 0 : index
      %141 = vector.load %arg11[%c6_77, %c0_78, %c0_79] : memref<8x8x4xbf16, #tpu.memory_space<vmem>>, vector<1x8x4xbf16>
      %142 = vector.shape_cast %141 : vector<1x8x4xbf16> to vector<8x4xbf16>
      %143 = vector.shape_cast %140 : vector<8x4xbf16> to vector<1x8x4xbf16>
      tpu.vector_store %arg11[%c6_77, %c0_78, %c0_79], %143 {strides = array<i32>} : memref<8x8x4xbf16, #tpu.memory_space<vmem>>, vector<1x8x4xbf16>,
      %144 = vector.extract_strided_slice %43 {offsets = [0, 24], sizes = [8, 4], strides = [1, 1]} : vector<8x32xf32> to vector<8x4xf32>
      %145 = arith.truncf %144 : vector<8x4xf32> to vector<8x4xbf16>
      %c6_80 = arith.constant 6 : index
      %c0_81 = arith.constant 0 : index
      %c0_82 = arith.constant 0 : index
      %146 = vector.load %arg12[%c6_80, %c0_81, %c0_82] : memref<8x8x4xbf16, #tpu.memory_space<vmem>>, vector<1x8x4xbf16>
      %147 = vector.shape_cast %146 : vector<1x8x4xbf16> to vector<8x4xbf16>
      %148 = vector.shape_cast %145 : vector<8x4xbf16> to vector<1x8x4xbf16>
      tpu.vector_store %arg12[%c6_80, %c0_81, %c0_82], %148 {strides = array<i32>} : memref<8x8x4xbf16, #tpu.memory_space<vmem>>, vector<1x8x4xbf16>,
      %149 = vector.extract_strided_slice %39 {offsets = [0, 28], sizes = [8, 4], strides = [1, 1]} : vector<8x32xf32> to vector<8x4xf32>
      %150 = arith.truncf %149 : vector<8x4xf32> to vector<8x4xbf16>
      %c7 = arith.constant 7 : index
      %c0_83 = arith.constant 0 : index
      %c0_84 = arith.constant 0 : index
      %151 = vector.load %arg10[%c7, %c0_83, %c0_84] : memref<8x8x4xbf16, #tpu.memory_space<vmem>>, vector<1x8x4xbf16>
      %152 = vector.shape_cast %151 : vector<1x8x4xbf16> to vector<8x4xbf16>
      %153 = vector.shape_cast %150 : vector<8x4xbf16> to vector<1x8x4xbf16>
      tpu.vector_store %arg10[%c7, %c0_83, %c0_84], %153 {strides = array<i32>} : memref<8x8x4xbf16, #tpu.memory_space<vmem>>, vector<1x8x4xbf16>,
      %154 = vector.extract_strided_slice %41 {offsets = [0, 28], sizes = [8, 4], strides = [1, 1]} : vector<8x32xf32> to vector<8x4xf32>
      %155 = arith.truncf %154 : vector<8x4xf32> to vector<8x4xbf16>
      %c7_85 = arith.constant 7 : index
      %c0_86 = arith.constant 0 : index
      %c0_87 = arith.constant 0 : index
      %156 = vector.load %arg11[%c7_85, %c0_86, %c0_87] : memref<8x8x4xbf16, #tpu.memory_space<vmem>>, vector<1x8x4xbf16>
      %157 = vector.shape_cast %156 : vector<1x8x4xbf16> to vector<8x4xbf16>
      %158 = vector.shape_cast %155 : vector<8x4xbf16> to vector<1x8x4xbf16>
      tpu.vector_store %arg11[%c7_85, %c0_86, %c0_87], %158 {strides = array<i32>} : memref<8x8x4xbf16, #tpu.memory_space<vmem>>, vector<1x8x4xbf16>,
      %159 = vector.extract_strided_slice %43 {offsets = [0, 28], sizes = [8, 4], strides = [1, 1]} : vector<8x32xf32> to vector<8x4xf32>
      %160 = arith.truncf %159 : vector<8x4xf32> to vector<8x4xbf16>
      %c7_88 = arith.constant 7 : index
      %c0_89 = arith.constant 0 : index
      %c0_90 = arith.constant 0 : index
      %161 = vector.load %arg12[%c7_88, %c0_89, %c0_90] : memref<8x8x4xbf16, #tpu.memory_space<vmem>>, vector<1x8x4xbf16>
      %162 = vector.shape_cast %161 : vector<1x8x4xbf16> to vector<8x4xbf16>
      %163 = vector.shape_cast %160 : vector<8x4xbf16> to vector<1x8x4xbf16>
      tpu.vector_store %arg12[%c7_88, %c0_89, %c0_90], %163 {strides = array<i32>} : memref<8x8x4xbf16, #tpu.memory_space<vmem>>, vector<1x8x4xbf16>,
    } else {
    }
    %3 = arith.index_cast %arg1 : i32 to index
    %c0 = arith.constant 0 : index
    %c0_1 = arith.constant 0 : index
    %4 = vector.load %arg10[%3, %c0, %c0_1] : memref<8x8x4xbf16, #tpu.memory_space<vmem>>, vector<1x8x4xbf16>
    %5 = vector.shape_cast %4 : vector<1x8x4xbf16> to vector<8x4xbf16>
    %6 = arith.index_cast %arg1 : i32 to index
    %c0_2 = arith.constant 0 : index
    %c0_3 = arith.constant 0 : index
    %7 = vector.load %arg11[%6, %c0_2, %c0_3] : memref<8x8x4xbf16, #tpu.memory_space<vmem>>, vector<1x8x4xbf16>
    %8 = vector.shape_cast %7 : vector<1x8x4xbf16> to vector<8x4xbf16>
    %9 = arith.index_cast %arg1 : i32 to index
    %c0_4 = arith.constant 0 : index
    %c0_5 = arith.constant 0 : index
    %10 = vector.load %arg12[%9, %c0_4, %c0_5] : memref<8x8x4xbf16, #tpu.memory_space<vmem>>, vector<1x8x4xbf16>
    %11 = vector.shape_cast %10 : vector<1x8x4xbf16> to vector<8x4xbf16>
    %cst = arith.constant dense<0.000000e+00> : vector<8x8xf32>
    %12 = tpu.matmul %5, %8, %cst {dimension_numbers = #tpu.dot_dimension_numbers<[1], [1], [0], [0], [0, 0, 1, 0], [], []>} : vector<8x4xbf16>, vector<8x4xbf16>, vector<8x8xf32> -> vector<8x8xf32>
    %c0_6 = arith.constant 0 : index
    %c0_7 = arith.constant 0 : index
    %13 = vector.load %arg8[%c0_6, %c0_7] : memref<8x8xf32, #tpu.memory_space<vmem>>, vector<8x8xf32>
    %14 = arith.addf %12, %13 : vector<8x8xf32>
    %cst_8 = arith.constant dense<0xFF800000> : vector<8xf32>
    %15 = vector.multi_reduction <maximumf>, %14, %cst_8 [1] : vector<8x8xf32> to vector<8xf32>
    %16 = vector.shape_cast %15 : vector<8xf32> to vector<8x1xf32>
    %17 = vector.broadcast %16 : vector<8x1xf32> to vector<8x8xf32>
    %18 = arith.subf %14, %17 : vector<8x8xf32>
    %19 = math.exp %18 : vector<8x8xf32>
    %cst_9 = arith.constant dense<0.000000e+00> : vector<8xf32>
    %20 = vector.multi_reduction <add>, %19, %cst_9 [1] : vector<8x8xf32> to vector<8xf32>
    %21 = vector.shape_cast %20 : vector<8xf32> to vector<8x1xf32>
    %22 = arith.truncf %19 : vector<8x8xf32> to vector<8x8xbf16>
    %cst_10 = arith.constant dense<0.000000e+00> : vector<8x4xf32>
    %23 = tpu.matmul %22, %11, %cst_10 {dimension_numbers = #tpu.dot_dimension_numbers<[1], [0], [0], [1], [0, 0, 1, 1], [], []>} : vector<8x8xbf16>, vector<8x4xbf16>, vector<8x4xf32> -> vector<8x4xf32>
    %24 = tpu.reciprocal %21 : vector<8x1xf32> -> vector<8x1xf32>
    %25 = vector.broadcast %24 : vector<8x1xf32> to vector<8x4xf32>
    %26 = arith.mulf %23, %25 : vector<8x4xf32>
    %27 = arith.truncf %26 : vector<8x4xf32> to vector<8x4xbf16>
    %28 = arith.index_cast %arg1 : i32 to index
    %c0_11 = arith.constant 0 : index
    %c0_12 = arith.constant 0 : index
    %29 = vector.load %arg13[%28, %c0_11, %c0_12] : memref<8x8x4xbf16, #tpu.memory_space<vmem>>, vector<1x8x4xbf16>
    %30 = vector.shape_cast %29 : vector<1x8x4xbf16> to vector<8x4xbf16>
    %31 = vector.shape_cast %27 : vector<8x4xbf16> to vector<1x8x4xbf16>
    tpu.vector_store %arg13[%28, %c0_11, %c0_12], %31 {strides = array<i32>} : memref<8x8x4xbf16, #tpu.memory_space<vmem>>, vector<1x8x4xbf16>,
    %c7_i32 = arith.constant 7 : i32
    %32 = arith.cmpi eq, %arg1, %c7_i32 : i32
    %33 = arith.extui %32 : i1 to i32
    %c0_i32_13 = arith.constant 0 : i32
    %34 = arith.cmpi ne, %33, %c0_i32_13 : i32
    scf.if %34 {
      %c0_14 = arith.constant 0 : index
      %c0_15 = arith.constant 0 : index
      %c0_16 = arith.constant 0 : index
      %35 = vector.load %arg13[%c0_14, %c0_15, %c0_16] : memref<8x8x4xbf16, #tpu.memory_space<vmem>>, vector<1x8x4xbf16>
      %36 = vector.shape_cast %35 : vector<1x8x4xbf16> to vector<8x4xbf16>
      %c1 = arith.constant 1 : index
      %c0_17 = arith.constant 0 : index
      %c0_18 = arith.constant 0 : index
      %37 = vector.load %arg13[%c1, %c0_17, %c0_18] : memref<8x8x4xbf16, #tpu.memory_space<vmem>>, vector<1x8x4xbf16>
      %38 = vector.shape_cast %37 : vector<1x8x4xbf16> to vector<8x4xbf16>
      %c2 = arith.constant 2 : index
      %c0_19 = arith.constant 0 : index
      %c0_20 = arith.constant 0 : index
      %39 = vector.load %arg13[%c2, %c0_19, %c0_20] : memref<8x8x4xbf16, #tpu.memory_space<vmem>>, vector<1x8x4xbf16>
      %40 = vector.shape_cast %39 : vector<1x8x4xbf16> to vector<8x4xbf16>
      %c3 = arith.constant 3 : index
      %c0_21 = arith.constant 0 : index
      %c0_22 = arith.constant 0 : index
      %41 = vector.load %arg13[%c3, %c0_21, %c0_22] : memref<8x8x4xbf16, #tpu.memory_space<vmem>>, vector<1x8x4xbf16>
      %42 = vector.shape_cast %41 : vector<1x8x4xbf16> to vector<8x4xbf16>
      %c4 = arith.constant 4 : index
      %c0_23 = arith.constant 0 : index
      %c0_24 = arith.constant 0 : index
      %43 = vector.load %arg13[%c4, %c0_23, %c0_24] : memref<8x8x4xbf16, #tpu.memory_space<vmem>>, vector<1x8x4xbf16>
      %44 = vector.shape_cast %43 : vector<1x8x4xbf16> to vector<8x4xbf16>
      %c5 = arith.constant 5 : index
      %c0_25 = arith.constant 0 : index
      %c0_26 = arith.constant 0 : index
      %45 = vector.load %arg13[%c5, %c0_25, %c0_26] : memref<8x8x4xbf16, #tpu.memory_space<vmem>>, vector<1x8x4xbf16>
      %46 = vector.shape_cast %45 : vector<1x8x4xbf16> to vector<8x4xbf16>
      %c6 = arith.constant 6 : index
      %c0_27 = arith.constant 0 : index
      %c0_28 = arith.constant 0 : index
      %47 = vector.load %arg13[%c6, %c0_27, %c0_28] : memref<8x8x4xbf16, #tpu.memory_space<vmem>>, vector<1x8x4xbf16>
      %48 = vector.shape_cast %47 : vector<1x8x4xbf16> to vector<8x4xbf16>
      %c7 = arith.constant 7 : index
      %c0_29 = arith.constant 0 : index
      %c0_30 = arith.constant 0 : index
      %49 = vector.load %arg13[%c7, %c0_29, %c0_30] : memref<8x8x4xbf16, #tpu.memory_space<vmem>>, vector<1x8x4xbf16>
      %50 = vector.shape_cast %49 : vector<1x8x4xbf16> to vector<8x4xbf16>
      %51 = tpu.concatenate %36, %38, %40, %42, %44, %46, %48, %50 in 1 : vector<8x4xbf16>, vector<8x4xbf16>, vector<8x4xbf16>, vector<8x4xbf16>, vector<8x4xbf16>, vector<8x4xbf16>, vector<8x4xbf16>, vector<8x4xbf16> -> vector<8x32xbf16>
      %c0_31 = arith.constant 0 : index
      %c0_32 = arith.constant 0 : index
      %52 = vector.load %arg6[%c0_31, %c0_32] : memref<32x32xbf16, #tpu.memory_space<vmem>>, vector<32x32xbf16>
      %cst_33 = arith.constant dense<0.000000e+00> : vector<8x32xf32>
      %53 = tpu.matmul %51, %52, %cst_33 {dimension_numbers = #tpu.dot_dimension_numbers<[1], [0], [0], [1], [0, 0, 1, 1], [], []>} : vector<8x32xbf16>, vector<32x32xbf16>, vector<8x32xf32> -> vector<8x32xf32>
      %c0_34 = arith.constant 0 : index
      %c0_35 = arith.constant 0 : index
      %54 = vector.load %arg7[%c0_34, %c0_35] : memref<1x32xf32, #tpu.memory_space<vmem>>, vector<1x32xf32>
      %55 = vector.broadcast %54 : vector<1x32xf32> to vector<8x32xf32>
      %56 = arith.addf %53, %55 : vector<8x32xf32>
      %c0_36 = arith.constant 0 : index
      %c0_37 = arith.constant 0 : index
      %c0_38 = arith.constant 0 : index
      %57 = vector.load %arg9[%c0_36, %c0_37, %c0_38] : memref<1x8x32xf32, #tpu.memory_space<vmem>>, vector<1x8x32xf32>
      %58 = vector.shape_cast %57 : vector<1x8x32xf32> to vector<8x32xf32>
      %59 = vector.shape_cast %56 : vector<8x32xf32> to vector<1x8x32xf32>
      tpu.vector_store %arg9[%c0_36, %c0_37, %c0_38], %59 {strides = array<i32>} : memref<1x8x32xf32, #tpu.memory_space<vmem>>, vector<1x8x32xf32>,
    } else {
    }
    return
  }
  func.func @transform_0(%arg0: i32, %arg1: i32) -> (i32, i32, i32) {
    %c0_i32 = arith.constant 0 : i32
    %c0_i32_0 = arith.constant 0 : i32
    %c0_i32_1 = arith.constant 0 : i32
    return %arg0, %c0_i32, %c0_i32_0 : i32, i32, i32
  }
  func.func @transform_1(%arg0: i32, %arg1: i32) -> (i32, i32) {
    %c0_i32 = arith.constant 0 : i32
    %c0_i32_0 = arith.constant 0 : i32
    %c0_i32_1 = arith.constant 0 : i32
    return %c0_i32, %c0_i32_0 : i32, i32
  }
  func.func @transform_2(%arg0: i32, %arg1: i32) -> (i32, i32) {
    %c0_i32 = arith.constant 0 : i32
    %c0_i32_0 = arith.constant 0 : i32
    %c0_i32_1 = arith.constant 0 : i32
    return %c0_i32, %c0_i32_0 : i32, i32
  }
  func.func @transform_3(%arg0: i32, %arg1: i32) -> (i32, i32) {
    %c0_i32 = arith.constant 0 : i32
    %c0_i32_0 = arith.constant 0 : i32
    %c0_i32_1 = arith.constant 0 : i32
    return %c0_i32, %c0_i32_0 : i32, i32
  }
  func.func @transform_4(%arg0: i32, %arg1: i32) -> (i32, i32) {
    %c0_i32 = arith.constant 0 : i32
    %c0_i32_0 = arith.constant 0 : i32
    %c0_i32_1 = arith.constant 0 : i32
    return %c0_i32, %c0_i32_0 : i32, i32
  }
  func.func @transform_5(%arg0: i32, %arg1: i32) -> (i32, i32) {
    %c0_i32 = arith.constant 0 : i32
    %c0_i32_0 = arith.constant 0 : i32
    %c0_i32_1 = arith.constant 0 : i32
    return %c0_i32, %c0_i32_0 : i32, i32
  }
  func.func @transform_6(%arg0: i32, %arg1: i32) -> (i32, i32) {
    %c0_i32 = arith.constant 0 : i32
    %c0_i32_0 = arith.constant 0 : i32
    %c0_i32_1 = arith.constant 0 : i32
    return %c0_i32, %c0_i32_0 : i32, i32
  }
  func.func @transform_7(%arg0: i32, %arg1: i32) -> (i32, i32, i32) {
    %c0_i32 = arith.constant 0 : i32
    %c0_i32_0 = arith.constant 0 : i32
    %c0_i32_1 = arith.constant 0 : i32
    return %arg0, %c0_i32, %c0_i32_0 : i32, i32, i32
  }
}

</mosaic_0001>

<bundles_post_ra>
// kernel: tpu_custom_call.1
= control target key start
LH: loop header
LB: loop body
LE: loop exit
PB: predicated region body
PF: predicated region fallthrough
CT: control target
= control target key end

     0   :  { %s2033_s0 = inlined_call_operand.hbm [shape: f32[2,8,32], index: 0, kind: input, shape index: {}]   ;;  %s2034_s1 = inlined_call_operand.hbm [shape: bf16[32,32], index: 1, kind: input, shape index: {}]   ;;  %s2035_s2 = inlined_call_operand.hbm [shape: bf16[32,32], index: 2, kind: input, shape index: {}]   ;;  %s2036_s3 = inlined_call_operand.hbm [shape: bf16[32,32], index: 3, kind: input, shape index: {}]   ;;  %s2037_s4 = inlined_call_operand.hbm [shape: bf16[32,32], index: 4, kind: input, shape index: {}]   ;;  %s2038_s5 = inlined_call_operand.vmem [shape: f32[1,32], index: 5, kind: input, shape index: {}]   ;;  %s2039_s6 = inlined_call_operand.vmem [shape: f32[8,8], index: 6, kind: input, shape index: {}]   ;;  %s2040_s7 = inlined_call_operand.hbm [shape: f32[2,8,32], index: 7, kind: output, shape index: {}]  }
   0x1   :  { %2047 = sst [smem:[#allocation21_spill]] %s2034_s1 }
   0x2   :  { %2048 = sst [smem:[#allocation22_spill]] %s2035_s2 }
   0x3   :  { %2049 = sst [smem:[#allocation23_spill]] %s2038_s5 }
   0x4   :  { %2050 = sst [smem:[#allocation24_spill]] %s2040_s7 }
   0x5   :  { %12 = vsyncpa [#allocation7], 0 }
   0x6   :  { %14 = vsyncpa [#allocation7 + $0x1], 0 }
   0x7   :  { %15 = vsyncpa [#allocation10], 0 }
   0x8   :  { %16 = vsyncpa [#allocation13], 0 }
   0x9   :  { %17 = vsyncpa [#allocation8], 0 }
   0xa   :  { %19 = vsyncpa [#allocation8 + $0x1], 0  ;;  %s1661_s24 = smov 0   ;;  %s1663_s25 = smov 0  }
   0xb   :  { %s1665_s26 = smov 0   ;;  %s1667_s27 = smov 0  }
   0xc   :  { %s1669_s28 = smov 0   ;;  %s1671_s29 = smov 0  }
   0xd   :  { %s1673_s30 = smov 0   ;;  %s1675_s8 = smov 0  }
   0xe LB: > { %2051 = sst [smem:[#allocation20_spill]] %s1579_s28  ;;  %s2041_s9 = sadd.s32 4294967295, %s1591_s8   ;;  %s1591_s8 = sphi %s1675_s8, %s25_s8   ;;  %s1587_s30 = sphi %s1673_s30, %s2078_s30   ;;  %s1583_s29 = sphi %s1671_s29, %s2077_s29   ;;  %s1579_s28 = sphi %s1669_s28, %s2076_s28   ;;  %s1575_s27 = sphi %s1667_s27, %s2075_s27   ;;  %s1571_s26 = sphi %s1665_s26, %s2074_s26   ;;  %s1567_s25 = sphi %s1663_s25, %s2073_s25   ;;  %s1563_s24 = sphi %s1661_s24, %s2072_s24  }
   0xf   : > { %p1070_p0 = scmp.ge.s32.totalorder %s1591_s8, 1  ;;  %p1705_p1 = scmp.eq.s32.totalorder %s2041_s9, 0 }
  0x10   : > { %p220_p2 = scmp.lt.s32.totalorder %s1591_s8, 17  ;;  %s1593_s12 = smov [#allocation9]  }
  0x11   : > { %s2052_s10 = scalar_select %p1705_p1, 1, 0 }
  0x12   : > { %p1710_p3 = pnand %p1070_p0, %p220_p2  ;;  %s232_s13 = sshll.u32 %s1593_s12, 4  ;;  %s1714_s13 = int_to_ptr.vmem [resolvable:$true] %s232_s13 }
  0x13   : > { %s1594_s15 = smov [#allocation12]   ;;  %s1595_s17 = smov [#allocation11]  }
  0x14   : > { %s2053_s11 = scalar_select %p1710_p3, 1, 0 }
  0x15   : > { %p1203_p4 = pneg %p1710_p3  ;;  %s258_s16 = sshll.u32 %s1594_s15, 4  ;;  %s1724_s16 = int_to_ptr.vmem [resolvable:$true] %s258_s16 }
  0x16   : > { %s1726_s18 = sshll.u32 %s1595_s17, 4  ;;  %s2055_s1 = sld [smem:[#allocation21_spill]]  ;;  %s246_s18 = int_to_ptr.vmem [resolvable:$true] %s1726_s18 }
  0x17   : > { %p1720_p5 = pnand %p1203_p4, %p1705_p1 }
  0x19   : > { %p1736_p7 = pneg %p1720_p5 }
  0x1c   : > { %s1343_s21 = scalar_lea.hbm %s2055_s1, 256 }
  0x1d   : > { %p1344_p6 = scmp.ne.s32.totalorder %s2055_s1, %s1343_s21  ;;  %p1350_p10 = scmp.lt.u32.totalorder %s1343_s21, %s2055_s1 }
  0x1f   : > { %p1346_p8 = pnand %p1736_p7, %p1344_p6 }
  0x21   : > { %p1347_p9 = pneg %p1346_p8 }
  0x23   : > { %p1352_p11 = pnand %p1350_p10, %p1347_p9 }
  0x25   : > { %1355 = shalt.err (!%p1352_p11)
}
  0x26   : > { %s1356_s19 = scalar_lea.vmem %s1714_s13, 256  ;;  %p1364_p2 = scmp.lt.s32.totalorder %s1714_s13, %s1714_s13 }
  0x27   : > { %p1357_p12 = scmp.ne.s32.totalorder %s1714_s13, %s1356_s19  ;;  %p1365_p4 = scmp.lt.s32.totalorder %s1356_s19, %s1356_s19 }
  0x29   : > { %p1359_p13 = pnand %p1357_p12, %p1736_p7  ;;  %p1366_p6 = por %p1365_p4, %p1364_p2 }
  0x2b   : > { %p1360_p0 = pneg %p1359_p13 }
  0x2d   : > { %p1367_p8 = pnand %p1366_p6, %p1360_p0 }
  0x2f   : > { %1370 = shalt.err (!%p1367_p8)
}
  0x30   : > { %s1596_s20 = smov 64   ;;  %s1597_s21 = smov 4  }
  0x31   : > { %1206 = dma.hbm_to_vmem [thread:$0]  (!%p1720_p5), %s2055_s1, 256, %s1714_s13, [#allocation10], %s1596_s20, %s1596_s20, %s1597_s21  }
  0x32   : > { %s1371_s19 = scalar_lea.hbm %s2036_s3, 256 }
  0x33   : > { %p1372_p9 = scmp.ne.s32.totalorder %s2036_s3, %s1371_s19  ;;  %p1378_p12 = scmp.lt.u32.totalorder %s1371_s19, %s2036_s3 }
  0x35   : > { %p1374_p10 = pnand %p1372_p9, %p1736_p7 }
  0x37   : > { %p1375_p11 = pneg %p1374_p10 }
  0x39   : > { %p1380_p13 = pnand %p1378_p12, %p1375_p11 }
  0x3b   : > { %1383 = shalt.err (!%p1380_p13)
}
  0x3c   : > { %s1384_s13 = scalar_lea.vmem %s1724_s16, 256  ;;  %p1392_p6 = scmp.lt.s32.totalorder %s1724_s16, %s1724_s16 }
  0x3d   : > { %p1385_p0 = scmp.ne.s32.totalorder %s1724_s16, %s1384_s13  ;;  %p1393_p8 = scmp.lt.s32.totalorder %s1384_s13, %s1384_s13 }
  0x3f   : > { %p1387_p2 = pnand %p1385_p0, %p1736_p7  ;;  %p1394_p9 = por %p1393_p8, %p1392_p6 }
  0x41   : > { %p1388_p4 = pneg %p1387_p2 }
  0x43   : > { %p1395_p10 = pnand %p1394_p9, %p1388_p4 }
  0x45   : > { %1398 = shalt.err (!%p1395_p10)
}
  0x46   : > { %1212 = dma.hbm_to_vmem [thread:$0]  (!%p1720_p5), %s2036_s3, 256, %s1724_s16, [#allocation13], %s1596_s20, %s1596_s20, %s1597_s21  }
  0x47   : > { %s2057_s2 = sld [smem:[#allocation22_spill]] }
  0x4d   : > { %s1399_s22 = scalar_lea.hbm %s2057_s2, 256 }
  0x4e   : > { %p1400_p11 = scmp.ne.s32.totalorder %s2057_s2, %s1399_s22  ;;  %p1406_p0 = scmp.lt.u32.totalorder %s1399_s22, %s2057_s2 }
  0x50   : > { %p1402_p12 = pnand %p1400_p11, %p1736_p7 }
  0x52   : > { %p1403_p13 = pneg %p1402_p12 }
  0x54   : > { %p1408_p2 = pnand %p1406_p0, %p1403_p13 }
  0x56   : > { %1411 = shalt.err (!%p1408_p2)
}
  0x57   : > { %s1412_s13 = scalar_lea.vmem %s246_s18, 256  ;;  %p1420_p9 = scmp.lt.s32.totalorder %s246_s18, %s246_s18 }
  0x58   : > { %p1413_p4 = scmp.ne.s32.totalorder %s246_s18, %s1412_s13  ;;  %p1421_p10 = scmp.lt.s32.totalorder %s1412_s13, %s1412_s13 }
  0x5a   : > { %p1415_p6 = pnand %p1413_p4, %p1736_p7  ;;  %p1422_p3 = por %p1421_p10, %p1420_p9 }
  0x5c   : > { %p1416_p8 = pneg %p1415_p6 }
  0x5e   : > { %p1423_p1 = pnand %p1422_p3, %p1416_p8 }
  0x60   : > { %1426 = shalt.err (!%p1423_p1)
}
  0x61   : > { %1209 = dma.hbm_to_vmem [thread:$0]  (!%p1720_p5), %s2057_s2, 256, %s246_s18, [#allocation10], %s1596_s20, %s1596_s20, %s1597_s21  }
  0x62   : > { %s1598_s7 = smov [#allocation14]   ;;  %s1427_s23 = scalar_lea.hbm %s2037_s4, 256 }
  0x63   : > { %s271_s28 = sshll.u32 %s1598_s7, 4  ;;  %p1428_p1 = scmp.ne.s32.totalorder %s2037_s4, %s1427_s23  ;;  %s272_s28 = int_to_ptr.vmem [resolvable:$true] %s271_s28 }
  0x64   : > { %p1434_p12 = scmp.lt.u32.totalorder %s1427_s23, %s2037_s4 }
  0x65   : > { %p1430_p3 = pnand %p1428_p1, %p1736_p7 }
  0x67   : > { %p1431_p11 = pneg %p1430_p3 }
  0x69   : > { %p1436_p13 = pnand %p1434_p12, %p1431_p11 }
  0x6b   : > { %1439 = shalt.err (!%p1436_p13)
}
  0x6c   : > { %s1440_s18 = scalar_lea.vmem %s272_s28, 256  ;;  %p1448_p6 = scmp.lt.s32.totalorder %s272_s28, %s272_s28 }
  0x6d   : > { %p1441_p0 = scmp.ne.s32.totalorder %s272_s28, %s1440_s18  ;;  %p1449_p8 = scmp.lt.s32.totalorder %s1440_s18, %s1440_s18 }
  0x6f   : > { %p1443_p2 = pnand %p1441_p0, %p1736_p7  ;;  %p1450_p9 = por %p1449_p8, %p1448_p6 }
  0x71   : > { %p1444_p4 = pneg %p1443_p2 }
  0x73   : > { %p1451_p10 = pnand %p1450_p9, %p1444_p4 }
  0x75   : > { %1454 = shalt.err (!%p1451_p10)
}
  0x76   : > { %1215 = dma.hbm_to_vmem [thread:$0]  (!%p1720_p5), %s2037_s4, 256, %s272_s28, [#allocation13], %s1596_s20, %s1596_s20, %s1597_s21  }
  0x77   : > { %s1069_s14 = sadd.s32 4294967294, %s1591_s8   ;;  %s34_s12 = sadd.s32 1, %s1583_s29 }
  0x78   : > { %p35_p7 = scmp.ge.s32.totalorder %s34_s12, 8  ;;  %s37_s7 = sadd.s32 1, %s1587_s30 }
  0x79   : > { %s44_s9 = sadd.s32 1, %s1571_s26  ;;  %p51_p1 = scmp.ne.s32.totalorder %s1571_s26, %s1567_s25 }
  0x7a   : > { %s2080_s12 = smov (%p35_p7, %s34_s12), 0  ;;  %s2082_s7 = smov (!%p35_p7, %s37_s7), %s1587_s30 }
  0x7b   : > { %p52_p3 = scmp.eq.s32.totalorder %s1591_s8, 0  ;;  %p57_p11 = scmp.ne.s32.totalorder %s1567_s25, %s1563_s24 }
  0x7c   : > { %p39_p12 = scmp.ge.s32.totalorder %s2082_s7, 2  ;;  %s2058_s22 = sadd.s32 4294967295, %s1591_s8  }
  0x7d   : > { %p207_p13 = scmp.eq.s32.totalorder %s2058_s22, 15  ;;  %p1843_p5 = por %p52_p3, %p51_p1 }
  0x7e   : > { %p2060_p0 = scmp.ne.s32.totalorder %s2052_s10, 0  ;;  %s2084_s7 = smov (%p39_p12, %s2082_s7), 0 }
  0x7f   : > { %p1855_p4 = por %p207_p13, %p51_p1  ;;  %p213_p6 = scmp.eq.s32.totalorder %s1069_s14, 15 }
  0x80   : > { %p1849_p2 = por %p2060_p0, %p57_p11  ;;  %s41_s23 = ssub.s32 %s1587_s30, %s2084_s7 }
  0x81   : > { %s2062_s28 = scalar_select %p1855_p4, 1, 0 }
  0x82   : > { %p1228_p8 = scmp.lt.s32.totalorder %s1591_s8, 16  ;;  %p42_p9 = scmp.eq.s32.totalorder %s41_s23, 0 }
  0x83   : > { %p1862_p10 = por %p213_p6, %p57_p11  ;;  %s291_s17 = sand.u32 1, %s1571_s26  }
  0x84   : > { %s1077_s19 = sshll.u32 %s1587_s30, 7  ;;  %s1076_s18 = sshll.u32 %s291_s17, 3 }
  0x85   : > { %s2063_s15 = scalar_select %p1862_p10, 1, 0 }
  0x86   : > { %s1869_s13 = scalar_select %p42_p9, %s1571_s26, %s44_s9  }
  0x87   : > { %s1874_s22 = scalar_lea.hbm %s2033_s0, %s1077_s19  ;;  %s295_s14 = scalar_lea.vmem [#allocation6], %s1076_s18 }
  0x88   : > { %s302_s23 = sshll.u32 %s295_s14, 4  ;;  %p1878_p7 = pnand %p1228_p8, %p1843_p5  ;;  %s1882_s23 = int_to_ptr.vmem [resolvable:$true] %s302_s23 }
  0x89   : > { %s292_s9 = scalar_lea.sflag [#allocation7], %s291_s17  ;;  %s1455_s2 = scalar_lea.hbm %s1874_s22, 128 }
  0x8a   : > { %p1456_p1 = scmp.ne.s32.totalorder %s1874_s22, %s1455_s2  ;;  %p1457_p3 = pneg %p1878_p7 }
  0x8b   : > { %s1460_s20 = scalar_lea.hbm %s2033_s0, 256  ;;  %p1461_p13 = scmp.lt.u32.totalorder %s1874_s22, %s2033_s0 }
  0x8c   : > { %p1458_p11 = pnand %p1457_p3, %p1456_p1  ;;  %p1462_p5 = scmp.lt.u32.totalorder %s1460_s20, %s1455_s2 }
  0x8d   : > { %p1464_p6 = scmp.lt.u32.totalorder %s1455_s2, %s1874_s22 }
  0x8e   : > { %p1459_p12 = pneg %p1458_p11  ;;  %p1463_p0 = por %p1462_p5, %p1461_p13 }
  0x90   : > { %p1465_p8 = por %p1464_p6, %p1463_p0 }
  0x92   : > { %p1466_p9 = pnand %p1465_p8, %p1459_p12 }
  0x94   : > { %1469 = shalt.err (!%p1466_p9)
}
  0x95   : > { %s1470_s17 = scalar_lea.vmem %s1882_s23, 128  ;;  %s1599_s14 = smov [#allocation6]  }
  0x96   : > { %p1471_p1 = scmp.ne.s32.totalorder %s1882_s23, %s1470_s17  ;;  %s1475_s19 = sshll.u32 %s1599_s14, 4  ;;  %s1476_s19 = int_to_ptr.vmem [resolvable:$false] %s1475_s19 }
  0x97   : > { %s1477_s18 = scalar_lea.vmem %s1476_s19, 256  ;;  %p1478_p4 = scmp.lt.s32.totalorder %s1882_s23, %s1476_s19 }
  0x98   : > { %p1473_p11 = pnand %p1471_p1, %p1457_p3  ;;  %p1479_p13 = scmp.lt.s32.totalorder %s1477_s18, %s1470_s17 }
  0x9a   : > { %p1474_p10 = pneg %p1473_p11  ;;  %p1480_p5 = por %p1479_p13, %p1478_p4 }
  0x9c   : > { %p1481_p0 = pnand %p1480_p5, %p1474_p10 }
  0x9e   : > { %1484 = shalt.err (!%p1481_p0)
}
  0x9f   : > { %1219 = dma.hbm_to_vmem [thread:$0]  (!%p1878_p7), %s1874_s22, 128, %s1882_s23, %s292_s9  }
  0xa0   : > { %p2065_p12 = scmp.ne.s32.totalorder %s2053_s11, 0 }
  0xa1   : > { %s1912_s2 = sand.u32 (!%p2065_p12), 1, %s1567_s25  }
  0xa2   : > { %311 = sbr.rel (%p2065_p12) target bundleno = 1534 (0x5fe), region = 48  ;;  %s1079_s20 = sshll.u32 (!%p2065_p12), %s1912_s2, 3 }
  0xa3   : > { %s314_s16 = scalar_lea.sflag (!%p2065_p12), [#allocation7], %s1912_s2  ;;  %s317_s5 = scalar_lea.vmem (!%p2065_p12), [#allocation6], %s1079_s20 }
  0xa9   : > { %1546 = dma.done.wait (%p1849_p2), %s314_s16, 128  }
  0xaa   : > { %1548 = vsyncadd (%p1849_p2), %s314_s16, 4294967168  ;;  %p2066_p4 = scmp.ne.s32.totalorder %s2052_s10, 0 }
  0xac   : > { %1550 = dma.done.wait (%p2066_p4), [#allocation10], 512  }
  0xad   : > { %1552 = vsyncadd (%p2066_p4), [#allocation10], 4294966784 }
  0xae   : > { %1554 = dma.done.wait (%p2066_p4), [#allocation13], 512  }
  0xaf   : > { %1556 = vsyncadd (%p2066_p4), [#allocation13], 4294966784  ;;  %s1928_s1 = scalar_lea.vmem [#allocation15], %s1079_s20  ;;  %p1085_p10 = scmp.ne.s32.totalorder %s1575_s27, 0 }
  0xb0   : > { %v1324_v0 = vld [vmem:[#allocation9] sm:$0xff] (!%p1085_p10)   ;;  %v1600_v1 = vmov (!%p1085_p10), 0.0   ;;  %v1325_v2 = vld [vmem:[#allocation11] sm:$0xff] (!%p1085_p10)   ;;  %v1326_v3 = vld [vmem:[#allocation9 + $0x8] sm:$0xff] (!%p1085_p10)   ;;  %vm1601_vm0 = vmmov (!%p1085_p10), 0   ;;  %vm387_vm1 = vcmask (!%p1085_p10), 261120  }
  0xb1   : > { %368 = sbr.rel (%p1085_p10) target bundleno = 555 (0x22b), region = 72  ;;  %1139 = vmatprep.subr.bf16.mxu0 (!%p1085_p10), %v1600_v1  ;;  %1147 = vmatprep.subr.bf16.mxu1 (!%p1085_p10), %v1600_v1  ;;  %v1327_v4 = vld [vmem:[#allocation11 + $0x8] sm:$0xff] (!%p1085_p10)   ;;  %v1328_v7 = vld [vmem:[#allocation12] sm:$0xff] (!%p1085_p10)   ;;  %v1329_v8 = vld [vmem:[#allocation12 + $0x8] sm:$0xff] (!%p1085_p10)   ;;  %vm544_vm2 = vcmask (!%p1085_p10), 27648   ;;  %s1602_s10 = smov (!%p1085_p10), 120  }
  0xb2   : > { %1140 = vmatpush3.bf16.msra.mxu0 (!%p1085_p10), %v1324_v0  ;;  %1143 = vmatprep.mubr.msk.bf16.mxu0 (!%p1085_p10), %vm1601_vm0, %v1600_v1  ;;  %v369_v5 = vld [vmem:[%s317_s5] sm:$0xff] (!%p1085_p10)  ;;  %s1603_s11 = smov (!%p1085_p10), 124   ;;  %s1604_s21 = smov (!%p1085_p10), 116  }
  0xb3   : > { %1148 = vmatpush3.bf16.msra.mxu1 (!%p1085_p10), %v1325_v2  ;;  %1141 = vmatprep.subr.bf16.mxu0 (!%p1085_p10), %v1600_v1  ;;  %v370_v6 = vpack.c.bf16 (!%p1085_p10), %v369_v5, %v369_v5  ;;  %s1605_s22 = smov (!%p1085_p10), 112   ;;  %s1606_s23 = smov (!%p1085_p10), 108  }
  0xb4   : > { %1149 = vmatprep.subr.bf16.mxu1 (!%p1085_p10), %v1600_v1  ;;  %1151 = vmatprep.mubr.msk.bf16.mxu1 (!%p1085_p10), %vm1601_vm0, %v1600_v1  ;;  %s1607_s9 = smov (!%p1085_p10), 104   ;;  %s1608_s17 = smov (!%p1085_p10), 100  }
  0xb6   : > { %1142 = vmatpush3.bf16.msra.mxu0 (!%p1085_p10), %v1326_v3 }
  0xb7   : > { %1150 = vmatpush3.bf16.msra.mxu1 (!%p1085_p10), %v1327_v4  ;;  %1155 = vmatprep.subr.bf16.mxu0 (!%p1085_p10), %v1600_v1 }
  0xb9   : > { %1144 = vmatmul.mubr.msk.bf16.vlgmr.msra.gmra.mrb[0].mxu0 %vm387_vm1, %v370_v6 }
  0xba   : > { %1152 = vmatmul.mubr.msk.bf16.vlgmr.msra.gmra.mrb[0].mxu1 %vm387_vm1, %v370_v6  ;;  %1156 = vmatpush3.bf16.msra.mxu0 %v1328_v7 }
  0xbb   : > { %1157 = vmatprep.subr.bf16.mxu0 %v1600_v1  ;;  %1159 = vmatprep.mubr.msk.bf16.mxu0 %vm1601_vm0, %v1600_v1 }
  0xbe   : > { %1158 = vmatpush3.bf16.msra.mxu0 %v1329_v8 }
  0xc1   : > { %1160 = vmatmul.mubr.msk.bf16.vlgmr.msra.gmra.mrb[4].mxu0 %vm387_vm1, %v370_v6 }
 0x18c   : > { %v425_v9 = vpop.f32.mrb[0].mxu0 }
 0x18d   : > { %v543_v10 = vpack.c.bf16 %v425_v9, %v425_v9  ;;  %v1145_v11 = vpop.f32.mrb[1].mxu0  ;;  %v481_v12 = vpop.f32.mrb[0].mxu1 }
 0x18e   : > { %v546_v13 = vpack.c.bf16 %v481_v12, %v481_v12  ;;  %v428_v14 = vpop.f32.mrb[2].mxu0  ;;  %v1153_v15 = vpop.f32.mrb[1].mxu1 }
 0x18f   : > { %545 = vst.msk [vmem:[#allocation2] sm:$0xf] %vm544_vm2, %v543_v10  ;;  %v484_v16 = vpop.f32.mrb[2].mxu1  ;;  %574 = vrot.lane.b32.xlu1 %v543_v10, %s1602_s10  ;;  %553 = vrot.lane.b32.xlu0 %v543_v10, %s1603_s11  ;;  %v1146_v17 = vpop.f32.mrb[3].mxu0 }
 0x190   : > { %547 = vst.msk [vmem:[#allocation3] sm:$0xf] %vm544_vm2, %v546_v13  ;;  %v1154_v18 = vpop.f32.mrb[3].mxu1 }
 0x193   : > { %594 = vrot.lane.b32.xlu1 %v546_v13, %s1604_s21  ;;  %561 = vrot.lane.b32.xlu0 %v546_v13, %s1603_s11 }
 0x194   : > { %v537_v19 = vpop.f32.mrb[4].mxu0 }
 0x195   : > { %v548_v20 = vpack.c.bf16 %v537_v19, %v537_v19  ;;  %v1161_v21 = vpop.f32.mrb[5].mxu0 }
 0x196   : > { %v540_v22 = vpop.f32.mrb[6].mxu0 }
 0x197   : > { %604 = vrot.lane.b32.xlu1 %v543_v10, %s1605_s22  ;;  %579 = vrot.lane.b32.xlu0 %v546_v13, %s1602_s10  ;;  %549 = vst.msk [vmem:[#allocation4] sm:$0xf] %vm544_vm2, %v548_v20  ;;  %v1162_v23 = vpop.f32.mrb[7].mxu0 }
 0x19b   : > { %624 = vrot.lane.b32.xlu1 %v546_v13, %s1606_s23  ;;  %589 = vrot.lane.b32.xlu0 %v543_v10, %s1604_s21 }
 0x19f   : > { %634 = vrot.lane.b32.xlu1 %v543_v10, %s1607_s9  ;;  %609 = vrot.lane.b32.xlu0 %v546_v13, %s1605_s22 }
 0x1a3   : > { %619 = vrot.lane.b32.xlu0 %v543_v10, %s1606_s23  ;;  %569 = vrot.lane.b32.xlu1 %v548_v20, %s1603_s11 }
 0x1a7   : > { %639 = vrot.lane.b32.xlu0 %v546_v13, %s1607_s9  ;;  %584 = vrot.lane.b32.xlu1 %v548_v20, %s1602_s10 }
 0x1ab   : > { %649 = vrot.lane.b32.xlu0 %v543_v10, %s1608_s17  ;;  %614 = vrot.lane.b32.xlu1 %v548_v20, %s1605_s22 }
 0x1af   : > { %599 = vrot.lane.b32.xlu0 %v548_v20, %s1604_s21  ;;  %644 = vrot.lane.b32.xlu1 %v548_v20, %s1607_s9 }
 0x1b3   : > { %629 = vrot.lane.b32.xlu0 %v548_v20, %s1606_s23  ;;  %654 = vrot.lane.b32.xlu1 %v546_v13, %s1608_s17 }
 0x1b7   : > { %659 = vrot.lane.b32.xlu0 %v548_v20, %s1608_s17 }
 0x201   : > { %v575_v24 = vpop.permute.xlu1 %574  ;;  %v554_v25 = vpop.permute.xlu0 %553 }
 0x202   : > { %578 = vst.msk [vmem:[#allocation2 + $0x8] sm:$0xf] %vm544_vm2, %v575_v24  ;;  %557 = vst.msk [vmem:[#allocation2 + $0x4] sm:$0xf] %vm544_vm2, %v554_v25 }
 0x205   : > { %v595_v26 = vpop.permute.xlu1 %594  ;;  %v562_v27 = vpop.permute.xlu0 %561 }
 0x206   : > { %598 = vst.msk [vmem:[#allocation3 + $0xc] sm:$0xf] %vm544_vm2, %v595_v26  ;;  %565 = vst.msk [vmem:[#allocation3 + $0x4] sm:$0xf] %vm544_vm2, %v562_v27 }
 0x209   : > { %v605_v28 = vpop.permute.xlu1 %604  ;;  %v580_v29 = vpop.permute.xlu0 %579 }
 0x20a   : > { %608 = vst.msk [vmem:[#allocation2 + $0x10] sm:$0xf] %vm544_vm2, %v605_v28  ;;  %583 = vst.msk [vmem:[#allocation3 + $0x8] sm:$0xf] %vm544_vm2, %v580_v29 }
 0x20d   : > { %v625_v30 = vpop.permute.xlu1 %624  ;;  %v590_v31 = vpop.permute.xlu0 %589 }
 0x20e   : > { %628 = vst.msk [vmem:[#allocation3 + $0x14] sm:$0xf] %vm544_vm2, %v625_v30  ;;  %593 = vst.msk [vmem:[#allocation2 + $0xc] sm:$0xf] %vm544_vm2, %v590_v31 }
 0x211   : > { %v635_v32 = vpop.permute.xlu1 %634  ;;  %v610_v33 = vpop.permute.xlu0 %609 }
 0x212   : > { %638 = vst.msk [vmem:[#allocation2 + $0x18] sm:$0xf] %vm544_vm2, %v635_v32  ;;  %613 = vst.msk [vmem:[#allocation3 + $0x10] sm:$0xf] %vm544_vm2, %v610_v33 }
 0x215   : > { %v620_v34 = vpop.permute.xlu0 %619  ;;  %v570_v35 = vpop.permute.xlu1 %569 }
 0x216   : > { %623 = vst.msk [vmem:[#allocation2 + $0x14] sm:$0xf] %vm544_vm2, %v620_v34  ;;  %573 = vst.msk [vmem:[#allocation4 + $0x4] sm:$0xf] %vm544_vm2, %v570_v35 }
 0x219   : > { %v640_v36 = vpop.permute.xlu0 %639  ;;  %v585_v37 = vpop.permute.xlu1 %584 }
 0x21a   : > { %643 = vst.msk [vmem:[#allocation3 + $0x18] sm:$0xf] %vm544_vm2, %v640_v36  ;;  %588 = vst.msk [vmem:[#allocation4 + $0x8] sm:$0xf] %vm544_vm2, %v585_v37 }
 0x21d   : > { %v650_v38 = vpop.permute.xlu0 %649  ;;  %v615_v39 = vpop.permute.xlu1 %614 }
 0x21e   : > { %653 = vst.msk [vmem:[#allocation2 + $0x1c] sm:$0xf] %vm544_vm2, %v650_v38  ;;  %618 = vst.msk [vmem:[#allocation4 + $0x10] sm:$0xf] %vm544_vm2, %v615_v39 }
 0x221   : > { %v600_v40 = vpop.permute.xlu0 %599  ;;  %v645_v41 = vpop.permute.xlu1 %644 }
 0x222   : > { %603 = vst.msk [vmem:[#allocation4 + $0xc] sm:$0xf] %vm544_vm2, %v600_v40  ;;  %648 = vst.msk [vmem:[#allocation4 + $0x18] sm:$0xf] %vm544_vm2, %v645_v41 }
 0x225   : > { %v630_v42 = vpop.permute.xlu0 %629  ;;  %v655_v43 = vpop.permute.xlu1 %654 }
 0x226   : > { %633 = vst.msk [vmem:[#allocation4 + $0x14] sm:$0xf] %vm544_vm2, %v630_v42  ;;  %658 = vst.msk [vmem:[#allocation3 + $0x1c] sm:$0xf] %vm544_vm2, %v655_v43 }
 0x229   : > { %v660_v44 = vpop.permute.xlu0 %659 }
 0x22a   : > { %663 = vst.msk [vmem:[#allocation4 + $0x1c] sm:$0xf] %vm544_vm2, %v660_v44 }
 0x22b PF: > { %s1959_s14 = sshll.u32 %s1575_s27, 2  ;;  %vm674_vm3 = vcmask 31744   ;;  %v1609_v45 = vmov 0.0   ;;  %vm1610_vm4 = vmmov 0   ;;  %v673_v49 = vld [vmem:[%s2039_s6] sm:$0xff]  ;;  %vm721_vm5 = vcmask 64512  }
 0x22c   : > { %1163 = vmatprep.subr.bf16.mxu0 %v1609_v45  ;;  %1165 = vmatprep.mubr.msk.bf16.mxu0 %vm1610_vm4, %v1609_v45  ;;  %s668_s19 = scalar_lea.vmem [#allocation3], %s1959_s14  ;;  %s665_s18 = scalar_lea.vmem [#allocation2], %s1959_s14  ;;  %vm735_vm6 = vcmask 1043456   ;;  %vm784_vm7 = vcmask 27648  }
 0x22d   : > { %v669_v46 = vld [vmem:[%s668_s19] sm:$0xf]  ;;  %1169 = vmatprep.subr.bf16.mxu1 %v1609_v45  ;;  %1171 = vmatprep.mubr.msk.bf16.mxu1 %vm1610_vm4, %v1609_v45  ;;  %s671_s5 = scalar_lea.vmem [#allocation4], %s1959_s14  ;;  %s783_s10 = scalar_lea.vmem [#allocation5], %s1959_s14 }
 0x22e   : > { %v679_v47 = vsel %vm674_vm3, %v669_v46, 0  ;;  %v666_v48 = vld [vmem:[%s665_s18] sm:$0xf]  ;;  %p1104_p2 = scmp.ne.s32.totalorder %s1575_s27, 7 }
 0x22f   : > { %1164 = vmatpush3.bf16.xpose.msra.mxu0 %v679_v47  ;;  %s1611_s11 = smov (!%p1104_p2), 4   ;;  %s1612_s21 = smov (!%p1104_p2), 12   ;;  %v1615_v14 = vmov (!%p1104_p2), 0.0   ;;  %v1341_v15 = vld [vmem:[#allocation14] sm:$0xff] (!%p1104_p2)   ;;  %v1342_v16 = vld [vmem:[#allocation14 + $0x8] sm:$0xff] (!%p1104_p2)   ;;  %vm1616_vm8 = vmmov (!%p1104_p2), 0  }
 0x230   : > { %s1613_s22 = smov (!%p1104_p2), 8   ;;  %s1614_s23 = smov (!%p1104_p2), 16   ;;  %1175 = vmatprep.subr.bf16.mxu0 (!%p1104_p2), %v1615_v14  ;;  %vm845_vm9 = vcmask (!%p1104_p2), 97280   ;;  %vm848_vm10 = vcmask (!%p1104_p2), 130048   ;;  %vm851_vm11 = vcmask (!%p1104_p2), 162816   ;;  %vm854_vm12 = vcmask (!%p1104_p2), 195584  }
 0x231   : > { %v672_v56 = vld [vmem:[%s671_s5] sm:$0xf]  ;;  %s1617_s27 = smov (!%p1104_p2), 20   ;;  %s1618_s9 = smov (!%p1104_p2), 24   ;;  %vm857_vm13 = vcmask (!%p1104_p2), 228352   ;;  %vm883_vm14 = vcmask (!%p1104_p2), 261120  }
 0x232   : > { %v737_v57 = vsel %vm735_vm6, %v672_v56, 0  ;;  %s1619_s17 = smov (!%p1104_p2), 28   ;;  %s2067_s18 = sld [smem:[#allocation23_spill]] (!%p1104_p2) }
 0x233   : > { %1170 = vmatpush3.bf16.msra.mxu1 %v737_v57 }
 0x236   : > { %1166 = vmatmul.mubr.msk.bf16.vlgmr.msra.gmra.mrb[0].mxu0 %vm674_vm3, %v666_v48 }
 0x237   : > { %1176 = vmatpush3.bf16.msra.mxu0 (!%p1104_p2), %v1341_v15  ;;  %1179 = vmatprep.mubr.msk.bf16.mxu0 (!%p1104_p2), %vm1616_vm8, %v1615_v14 }
 0x238   : > { %1177 = vmatprep.subr.bf16.mxu0 (!%p1104_p2), %v1615_v14  ;;  %v1112_v33 = vld [vmem:[%s2067_s18] ss:$0 sm:$0xff] (!%p1104_p2) }
 0x23b   : > { %1178 = vmatpush3.bf16.msra.mxu0 (!%p1104_p2), %v1342_v16 }
 0x309   : > { %v715_v50 = vpop.f32.mrb[0].mxu0 }
 0x30a   : > { %v716_v51 = vadd.f32 %v715_v50, %v673_v49  ;;  %v1167_v52 = vpop.f32.mrb[1].mxu0 }
 0x30b   : > { %v718_v53 = vpop.f32.mrb[2].mxu0 }
 0x30c   : > { %v1168_v54 = vpop.f32.mrb[3].mxu0  ;;  %v722_v55 = vsel %vm721_vm5, %v716_v51, -inf }
 0x30d   : > { %723 = vmax.xlane.f32.xlu0 %v722_v55 }
 0x39a   : > { %v724_v58 = vpop.xlane.xlu0 %723 }
 0x39b   : > { %v725_v59 = vsub.f32 %v716_v51, %v724_v58 }
 0x39d   : > { %v726_v60 = vmul.f32 1.442695, %v725_v59 }
 0x39f   : > { %1330 = vpow2.f32 %v726_v60 }
 0x3a9   : > { %v1331_v61 = vpop.eup %1330 }
 0x3aa   : > { %v728_v62 = vsel %vm721_vm5, %v1331_v61, 0.0  ;;  %v731_v63 = vpack.c.bf16 %v1331_v61, %v1331_v61 }
 0x3ab   : > { %729 = vadd.xlane.f32.xlu0 %v728_v62 }
 0x3ac   : > { %1172 = vmatmul.mubr.msk.bf16.vlgmr.msra.gmra.mrb[0].mxu1 %vm721_vm5, %v731_v63 }
 0x438   : > { %v730_v0 = vpop.xlane.xlu0 %729 }
 0x439   : > { %1332 = vrcp.f32 %v730_v0 }
 0x443   : > { %v1333_v1 = vpop.eup %1332 }
 0x47e   : > { %789 = sbr.rel (%p1104_p2) target bundleno = 1507 (0x5e3), region = 76 }
 0x47f   : > { %v773_v2 = vpop.f32.mrb[0].mxu1 }
 0x480   : > { %v780_v3 = vmul.f32 %v1333_v1, %v773_v2  ;;  %v1173_v4 = vpop.f32.mrb[1].mxu1 }
 0x481   : > { %v776_v5 = vpop.f32.mrb[2].mxu1 }
 0x482   : > { %v781_v6 = vpack.c.bf16 %v780_v3, %v780_v3  ;;  %v1174_v7 = vpop.f32.mrb[3].mxu1 }
 0x484   : > { %785 = vst.msk [vmem:[%s783_s10] sm:$0xf] %vm784_vm7, %v781_v6 }
 0x48b   : > { %v1334_v8 = vld [vmem:[#allocation5 + $0x4] ss:$0 sps:$4 sm:$0xff]   ;;  %v1335_v9 = vld [vmem:[#allocation5 + $0xc] ss:$0 sps:$4 sm:$0xff]   ;;  %v1336_v10 = vld [vmem:[#allocation5 + $0x8] ss:$0 sps:$4 sm:$0xff]  }
 0x48c   : > { %808 = vrot.lane.b32.xlu0 %v1334_v8, %s1611_s11  ;;  %818 = vrot.lane.b32.xlu1 %v1335_v9, %s1612_s21  ;;  %v1337_v11 = vld [vmem:[#allocation5 + $0x10] ss:$0 sps:$4 sm:$0xff]   ;;  %v1338_v12 = vld [vmem:[#allocation5 + $0x14] ss:$0 sps:$4 sm:$0xff]   ;;  %v1339_v13 = vld [vmem:[#allocation5 + $0x18] ss:$0 sps:$4 sm:$0xff]  }
 0x48d   : > { %v1340_v17 = vld [vmem:[#allocation5 + $0x1c] ss:$0 sps:$4 sm:$0xff]   ;;  %v790_v19 = vld [vmem:[#allocation5] sm:$0xf] }
 0x490   : > { %813 = vrot.lane.b32.xlu0 %v1336_v10, %s1613_s22  ;;  %823 = vrot.lane.b32.xlu1 %v1337_v11, %s1614_s23 }
 0x494   : > { %828 = vrot.lane.b32.xlu0 %v1338_v12, %s1617_s27  ;;  %833 = vrot.lane.b32.xlu1 %v1339_v13, %s1618_s9 }
 0x498   : > { %838 = vrot.lane.b32.xlu0 %v1340_v17, %s1619_s17 }
 0x4fe   : > { %v809_v18 = vpop.permute.xlu0 %808  ;;  %v819_v20 = vpop.permute.xlu1 %818 }
 0x4ff   : > { %v842_v21 = vsel %vm674_vm3, %v790_v19, %v809_v18 }
 0x502   : > { %v814_v22 = vpop.permute.xlu0 %813  ;;  %v824_v24 = vpop.permute.xlu1 %823 }
 0x503   : > { %v844_v23 = vsel %vm721_vm5, %v842_v21, %v814_v22 }
 0x504   : > { %v847_v25 = vsel %vm845_vm9, %v844_v23, %v819_v20 }
 0x505   : > { %v850_v26 = vsel %vm848_vm10, %v847_v25, %v824_v24 }
 0x506   : > { %v829_v27 = vpop.permute.xlu0 %828  ;;  %v834_v29 = vpop.permute.xlu1 %833 }
 0x507   : > { %v853_v28 = vsel %vm851_vm11, %v850_v26, %v829_v27 }
 0x508   : > { %v856_v30 = vsel %vm854_vm12, %v853_v28, %v834_v29 }
 0x50a   : > { %v839_v31 = vpop.permute.xlu0 %838 }
 0x50b   : > { %v859_v32 = vsel %vm857_vm13, %v856_v30, %v839_v31 }
 0x50c   : > { %1180 = vmatmul.mubr.msk.bf16.vlgmr.msra.gmra.mrb[0].mxu0 %vm883_vm14, %v859_v32 }
 0x5df   : > { %v920_v34 = vpop.f32.mrb[0].mxu0 }
 0x5e0   : > { %v921_v35 = vadd.f32 %v1112_v33, %v920_v34  ;;  %v1181_v36 = vpop.f32.mrb[1].mxu0 }
 0x5e1   : > { %v923_v37 = vpop.f32.mrb[2].mxu0 }
 0x5e2   : > { %926 = vst.msk [vmem:[%s1928_s1] sm:$0xff] %vm883_vm14, %v921_v35  ;;  %v1182_v38 = vpop.f32.mrb[3].mxu0 }
 0x5e3 PF: > { %s2068_s20 = sld [smem:[#allocation20_spill]]  ;;  %s2069_s11 = sld [smem:[#allocation24_spill]] }
 0x5e4   : > { %s941_s22 = sshll.u32 %s1928_s1, 4  ;;  %s928_s23 = scalar_lea.sflag [#allocation8], %s1912_s2  ;;  %s942_s22 = int_to_ptr.vmem [resolvable:$true] %s941_s22 }
 0x5e5   : > { %s1485_s27 = scalar_lea.vmem %s942_s22, 128  ;;  %p2070_p3 = scmp.ne.s32.totalorder %s2062_s28, 0 }
 0x5e6   : > { %p1486_p7 = scmp.ne.s32.totalorder %s942_s22, %s1485_s27  ;;  %s1620_s9 = smov [#allocation15]  }
 0x5e7   : > { %s1489_s17 = sshll.u32 %s1620_s9, 4  ;;  %s1490_s17 = int_to_ptr.vmem [resolvable:$false] %s1489_s17 }
 0x5e8   : > { %p1487_p6 = pnand %p1486_p7, %p2070_p3  ;;  %s1491_s14 = scalar_lea.vmem %s1490_s17, 256 }
 0x5e9   : > { %s1117_s16 = sshll.u32 %s2068_s20, 7  ;;  %p1492_p9 = scmp.lt.s32.totalorder %s942_s22, %s1490_s17 }
 0x5ea   : > { %s1984_s21 = scalar_lea.hbm %s2069_s11, %s1117_s16  ;;  %p1488_p8 = pneg %p1487_p6 }
 0x5eb   : > { %p1493_p1 = scmp.lt.s32.totalorder %s1491_s14, %s1485_s27 }
 0x5ed   : > { %p1494_p11 = por %p1493_p1, %p1492_p9 }
 0x5ef   : > { %p1495_p13 = pnand %p1494_p11, %p1488_p8 }
 0x5f1   : > { %1498 = shalt.err (!%p1495_p13)
}
 0x5f2   : > { %s1499_s2 = scalar_lea.hbm %s1984_s21, 128  ;;  %s1503_s18 = scalar_lea.hbm %s2069_s11, 256 }
 0x5f3   : > { %p1500_p5 = scmp.ne.s32.totalorder %s1984_s21, %s1499_s2  ;;  %p1504_p4 = scmp.lt.u32.totalorder %s1984_s21, %s2069_s11 }
 0x5f4   : > { %p1505_p10 = scmp.lt.u32.totalorder %s1503_s18, %s1499_s2  ;;  %p1507_p7 = scmp.lt.u32.totalorder %s1499_s2, %s1984_s21 }
 0x5f5   : > { %p1501_p0 = pnand %p1500_p5, %p2070_p3 }
 0x5f6   : > { %p1506_p2 = por %p1505_p10, %p1504_p4 }
 0x5f7   : > { %p1502_p12 = pneg %p1501_p0 }
 0x5f8   : > { %p1508_p6 = por %p1507_p7, %p1506_p2 }
 0x5fa   : > { %p1509_p8 = pnand %p1508_p6, %p1502_p12 }
 0x5fc   : > { %1512 = shalt.err (!%p1509_p8)
}
 0x5fd   : > { %1201 = dma.vmem_to_hbm [thread:$0]  (%p2070_p3), %s942_s22, 128, %s1984_s21, %s928_s23  }
 0x5fe PF: > { %p1233_p9 = scmp.ge.s32.totalorder %s1591_s8, 2  ;;  %s953_s5 = sand.u32 1, %s1563_s24  }
 0x5ff   : > { %p2071_p1 = scmp.ne.s32.totalorder %s2063_s15, 0  ;;  %s954_s10 = scalar_lea.sflag [#allocation8], %s953_s5 }
 0x601   : > { %p1221_p11 = pnand %p1233_p9, %p2071_p1 }
 0x603   : > { %1558 = dma.done.wait (!%p1221_p11), %s954_s10, 128  }
 0x604   : > { %1560 = vsyncadd (!%p1221_p11), %s954_s10, 4294967168  ;;  %s25_s8 = sadd.s32 1, %s1591_s8   ;;  %s2072_s24 = smov %s1567_s25 }
 0x605   : > { %p22_p13 = scmp.ge.s32.totalorder %s25_s8, 18   ;;  %s2073_s25 = smov %s1571_s26 }
 0x606   : > { %s2074_s26 = smov %s1869_s13  ;;  %s2075_s27 = smov %s1583_s29 }
 0x607   : > { %s2076_s28 = smov %s1587_s30  ;;  %s2077_s29 = smov %s2080_s12 }
 0x608   : > { %s2078_s30 = smov %s2084_s7  ;;  %24 = sbr.rel (!%p22_p13) target bundleno = 14 (0xe), region = 149 }
 0x60f   :  { %959 = vsyncpa [#allocation7], 1 }
 0x610   :  { %961 = vsyncpa [#allocation7 + $0x1], 1 }
 0x611   :  { %962 = vsyncpa [#allocation10], 1 }
 0x612   :  { %963 = vsyncpa [#allocation13], 1 }
 0x613   :  { %964 = vsyncpa [#allocation8], 1 }
 0x614   :  { %966 = vsyncpa [#allocation8 + $0x1], 1 }

</bundles_post_ra>
